<compile_context>
chip_gen: v6e
topology: v6e:2x2x1
jax: 0.10.0
libtpu: 0.0.40
codegen_flags: <defaults>
</compile_context>

<pallas_src>
import functools

import jax
import jax.numpy as jnp
from jax.experimental import pallas as pl
from jax.experimental.pallas import tpu as pltpu


def _learnable_sigmoid_kernel(slope_ref, x_ref, o_ref, *, beta: float):
    # slope_ref: (F, 1) ; x_ref / o_ref: (b_tile, F, t_tile)
    x = x_ref[...].astype(jnp.float32)                 # f32 compute everywhere
    slope = slope_ref[...].astype(jnp.float32)         # (F, 1)
    z = slope[None, :, :] * x                          # broadcast over B, T
    y = jax.nn.sigmoid(z)                              # logistic -> EUP exp
    if beta != 1.0:                                    # compile-time branch
        y = beta * y
    o_ref[...] = y.astype(o_ref.dtype)


def _choose_tiles(B, F, T, itemsize, target_bytes=2 * 1024 * 1024):
    """Pick (b_tile, t_tile): lane-dense blocks of roughly target_bytes."""
    if T >= 128:
        # Largest multiple of 128 such that one batch-row block <= target,
        # capped at the largest multiple of 128 that fits inside T (the
        # ragged remainder is handled by a padded final block).
        max_t = max(128, ((target_bytes // max(F * itemsize, 1)) // 128) * 128)
        t_tile = min((T // 128) * 128, max_t)
    else:
        # T < 128: last block dim must equal the full array dim.
        t_tile = T
    row_bytes = F * t_tile * itemsize
    b_tile = int(max(1, min(B, target_bytes // max(row_bytes, 1))))
    return b_tile, t_tile


def learnable_sigmoid_2d(x: jax.Array, slope: jax.Array, beta: float = 1.0,
                         b_tile: int | None = None,
                         t_tile: int | None = None) -> jax.Array:
    """beta * sigmoid(slope * x); x: (B, F, T), slope: (F, 1)."""
    B, F, T = x.shape
    assert slope.shape == (F, 1)

    auto_b, auto_t = _choose_tiles(B, F, T, jnp.dtype(x.dtype).itemsize)
    b_tile = auto_b if b_tile is None else min(b_tile, B)
    t_tile = auto_t if t_tile is None else min(t_tile, T)

    grid = (pl.cdiv(B, b_tile), pl.cdiv(T, t_tile))

    kernel = functools.partial(_learnable_sigmoid_kernel, beta=float(beta))

    return pl.pallas_call(
        kernel,
        out_shape=jax.ShapeDtypeStruct((B, F, T), x.dtype),
        grid_spec=pl.GridSpec(
            grid=grid,
            in_specs=[
                # slope: full (F, 1) array, constant block index -> resident.
                pl.BlockSpec((F, 1), lambda b, t: (0, 0)),
                # x: (b_tile, F, t_tile) tile per grid step.
                pl.BlockSpec((b_tile, F, t_tile), lambda b, t: (b, 0, t)),
            ],
            out_specs=pl.BlockSpec((b_tile, F, t_tile), lambda b, t: (b, 0, t)),
        ),
        compiler_params=pltpu.CompilerParams(
            # Both grid axes are fully independent -> megacore-shardable.
            dimension_semantics=("parallel", "parallel"),
            # Headroom for double-buffered ~2 MiB in + out tiles; safe on
            # v5e (128 MiB), v6e (128 MiB) and v7x (64 MiB per TC).
            vmem_limit_bytes=48 * 1024 * 1024,
        ),
    )(slope, x)


if __name__ == "__main__":
    key = jax.random.PRNGKey(0)
    beta = 2.0

    # --- Main small example (in_features = F = 16) -------------------------
    B, F, T = 2, 16, 256
    kx, ks, kx2 = jax.random.split(key, 3)
    x = jax.random.normal(kx, (B, F, T), dtype=jnp.float32)
    # PyTorch init is torch.ones(in_features, 1); perturb deterministically so
    # the per-feature broadcast is actually exercised.
    slope = jnp.ones((F, 1), jnp.float32) + 0.1 * jax.random.normal(
        ks, (F, 1), dtype=jnp.float32
    )
    ref = beta * jax.nn.sigmoid(slope[None, :, :] * x)

    # 1) Default (auto-tiled) path: whole problem fits one big block.
    out = jax.block_until_ready(learnable_sigmoid_2d(x, slope, beta=beta))
    assert out.shape == (B, F, T)
    assert jnp.allclose(out, ref, atol=1e-6, rtol=1e-6)

    # 2) Forced multi-tile path: exercises the (batch, time) grid index_maps.
    out_tiled = jax.block_until_ready(
        learnable_sigmoid_2d(x, slope, beta=beta, b_tile=1, t_tile=128)
    )
    assert jnp.allclose(out_tiled, ref, atol=1e-6, rtol=1e-6)

    # 3) beta == 1.0 compile-time branch.
    out_b1 = jax.block_until_ready(learnable_sigmoid_2d(x, slope, beta=1.0))
    assert jnp.allclose(out_b1, jax.nn.sigmoid(slope[None, :, :] * x),
                        atol=1e-6, rtol=1e-6)

    # 4) Ragged shapes (B and T not multiples of tile sizes) -> padded blocks.
    B2, F2, T2 = 3, 10, 200
    x2 = jax.random.normal(kx2, (B2, F2, T2), dtype=jnp.float32)
    slope2 = jnp.linspace(0.5, 1.5, F2, dtype=jnp.float32).reshape(F2, 1)
    ref2 = beta * jax.nn.sigmoid(slope2[None, :, :] * x2)
    out2 = jax.block_until_ready(
        learnable_sigmoid_2d(x2, slope2, beta=beta, b_tile=2, t_tile=128)
    )
    assert jnp.allclose(out2, ref2, atol=1e-6, rtol=1e-6)

    print("KERNEL_OK")
</pallas_src>

<mosaic_0001>
module attributes {stable_mosaic.version = 11 : i64} {
  func.func @_learnable_sigmoid_kernel(%arg0: i32, %arg1: i32, %arg2: memref<16x1xf32, #tpu.memory_space<vmem>>, %arg3: memref<2x16x256xf32, #tpu.memory_space<vmem>>, %arg4: memref<2x16x256xf32, #tpu.memory_space<vmem>>) attributes {dimension_semantics = [#tpu.dimension_semantics<parallel>, #tpu.dimension_semantics<parallel>], iteration_bounds = array<i64: 1, 1>, scalar_prefetch = 0 : i64, scratch_operands = 0 : i64, tpu.core_type = #tpu.core_type<tc>, window_params = [{pipeline_mode = #tpu.pipeline_mode<synchronous>, transform_indices = @transform_0, window_bounds = array<i64: 16, 1>}, {transform_indices = @transform_1, window_bounds = array<i64: 2, 16, 256>}, {transform_indices = @transform_2, window_bounds = array<i64: 2, 16, 256>}]} {
    %c0 = arith.constant 0 : index
    %c0_0 = arith.constant 0 : index
    %c0_1 = arith.constant 0 : index
    %0 = vector.load %arg3[%c0, %c0_0, %c0_1] : memref<2x16x256xf32, #tpu.memory_space<vmem>>, vector<2x16x256xf32>
    %c0_2 = arith.constant 0 : index
    %c0_3 = arith.constant 0 : index
    %1 = vector.load %arg2[%c0_2, %c0_3] : memref<16x1xf32, #tpu.memory_space<vmem>>, vector<16x1xf32>
    %2 = vector.shape_cast %1 : vector<16x1xf32> to vector<1x16x1xf32>
    %3 = vector.broadcast %2 : vector<1x16x1xf32> to vector<2x16x256xf32>
    %4 = arith.mulf %3, %0 : vector<2x16x256xf32>
    %5 = arith.negf %4 : vector<2x16x256xf32>
    %6 = math.exp %5 : vector<2x16x256xf32>
    %cst = arith.constant 1.000000e+00 : f32
    %7 = vector.broadcast %cst : f32 to vector<2x16x256xf32>
    %8 = arith.addf %7, %6 : vector<2x16x256xf32>
    %9 = arith.divf %7, %8 : vector<2x16x256xf32>
    %cst_4 = arith.constant 2.000000e+00 : f32
    %10 = vector.broadcast %cst_4 : f32 to vector<2x16x256xf32>
    %11 = arith.mulf %10, %9 : vector<2x16x256xf32>
    %c0_5 = arith.constant 0 : index
    %c0_6 = arith.constant 0 : index
    %c0_7 = arith.constant 0 : index
    %12 = vector.load %arg4[%c0_5, %c0_6, %c0_7] : memref<2x16x256xf32, #tpu.memory_space<vmem>>, vector<2x16x256xf32>
    tpu.vector_store %arg4[%c0_5, %c0_6, %c0_7], %11 {strides = array<i32>} : memref<2x16x256xf32, #tpu.memory_space<vmem>>, vector<2x16x256xf32>,
    return
  }
  func.func @transform_0(%arg0: i32, %arg1: i32) -> (i32, i32) {
    %c0_i32 = arith.constant 0 : i32
    %c0_i32_0 = arith.constant 0 : i32
    %c0_i32_1 = arith.constant 0 : i32
    return %c0_i32, %c0_i32_0 : i32, i32
  }
  func.func @transform_1(%arg0: i32, %arg1: i32) -> (i32, i32, i32) {
    %c0_i32 = arith.constant 0 : i32
    %c0_i32_0 = arith.constant 0 : i32
    return %arg0, %c0_i32, %arg1 : i32, i32, i32
  }
  func.func @transform_2(%arg0: i32, %arg1: i32) -> (i32, i32, i32) {
    %c0_i32 = arith.constant 0 : i32
    %c0_i32_0 = arith.constant 0 : i32
    return %arg0, %c0_i32, %arg1 : i32, i32, i32
  }
}

</mosaic_0001>

<bundles_post_ra>
// kernel: tpu_custom_call.1
= control target key start
LH: loop header
LB: loop body
LE: loop exit
PB: predicated region body
PF: predicated region fallthrough
CT: control target
= control target key end

     0   :  { %7 = vsyncpa [#allocation3], 0  ;;  %s263_s0 = inlined_call_operand.vmem [shape: f32[16,1], index: 0, kind: input, shape index: {}]   ;;  %s264_s1 = inlined_call_operand.hbm [shape: f32[2,16,256], index: 1, kind: input, shape index: {}]   ;;  %s265_s2 = inlined_call_operand.hbm [shape: f32[2,16,256], index: 2, kind: output, shape index: {}]  }
   0x1   :  { %8 = vsyncpa [#allocation4], 0  ;;  %s225_s9 = smov [#allocation2]  }
   0x2   :  { %s16_s10 = sshll.u32 %s225_s9, 4  ;;  %s17_s10 = int_to_ptr.vmem [resolvable:$true] %s16_s10 }
   0x3   :  { %s189_s11 = scalar_lea.vmem %s17_s10, 1024  ;;  %p194_p1 = scmp.lt.s32.totalorder %s17_s10, %s17_s10 }
   0x4   :  { %p190_p0 = scmp.ne.s32.totalorder %s17_s10, %s189_s11  ;;  %p195_p2 = scmp.lt.s32.totalorder %s189_s11, %s189_s11 }
   0x6   :  { %p196_p3 = por %p195_p2, %p194_p1 }
   0x8   :  { %p197_p4 = pnand %p196_p3, %p190_p0 }
   0xa   :  { %200 = shalt.err (!%p197_p4)
}
   0xb   :  { %s226_s12 = smov 256   ;;  %s227_s13 = smov 16  }
   0xc   :  { %22 = dma.hbm_to_vmem [thread:$0]  %s264_s1, 1024, %s17_s10, [#allocation3], %s226_s12, %s226_s12, %s227_s13  }
   0xd   :  { %221 = dma.done.wait [#allocation3], 1024  }
   0xe   :  { %222 = vsyncadd [#allocation3], 4294966272  ;;  %v228_v0 = vmov 0   ;;  %v34_v1 = vld [vmem:[%s263_s0] sm:$0xff]  ;;  %v35_v2 = vld [vmem:[%s263_s0 + $0x8] sm:$0xff]  ;;  %s229_s0 = smov [#allocation5]  }
   0xf   :  { %148 = vset.pattern.permute.xlu0 %v228_v0  ;;  %v26_v3 = vld [vmem:[#allocation2] sm:$0xff]  ;;  %v27_v4 = vld [vmem:[#allocation2 + $0x8] sm:$0xff]  ;;  %v28_v12 = vld [vmem:[#allocation2 + $0x10] sm:$0xff]  ;;  %s123_s1 = sshll.u32 %s229_s0, 4  ;;  %s124_s1 = int_to_ptr.vmem [resolvable:$true] %s123_s1 }
  0x10   :  { %38 = vperm.xlu0 %148, %v34_v1   ;;  %v30_v5 = vld [vmem:[#allocation2 + $0x20] sm:$0xff]  ;;  %v31_v6 = vld [vmem:[#allocation2 + $0x28] sm:$0xff]  ;;  %v29_v13 = vld [vmem:[#allocation2 + $0x18] sm:$0xff]  ;;  %s201_s20 = scalar_lea.vmem %s124_s1, 1024  ;;  %p206_p6 = scmp.lt.s32.totalorder %s124_s1, %s124_s1 }
  0x11   :  { %v32_v14 = vld [vmem:[#allocation2 + $0x30] sm:$0xff]  ;;  %v33_v15 = vld [vmem:[#allocation2 + $0x38] sm:$0xff]  ;;  %p202_p5 = scmp.ne.s32.totalorder %s124_s1, %s201_s20  ;;  %p207_p7 = scmp.lt.s32.totalorder %s201_s20, %s201_s20 }
  0x13   :  { %p208_p8 = por %p207_p7, %p206_p6 }
  0x14   :  { %43 = vperm.xlu0 %148, %v35_v2  }
  0x15   :  { %p209_p9 = pnand %p208_p8, %p202_p5 }
  0x8b   :  { %v39_v7 = vpop.permute.xlu0 %38 }
  0x8c   :  { %v46_v8 = vmul.f32 %v39_v7, %v26_v3  ;;  %v47_v9 = vmul.f32 %v39_v7, %v27_v4  ;;  %v50_v10 = vmul.f32 %v39_v7, %v30_v5  ;;  %v51_v11 = vmul.f32 %v39_v7, %v31_v6 }
  0x8e   :  { %v135_v16 = vmul.f32 -1.442695, %v46_v8  ;;  %v136_v17 = vmul.f32 -1.442695, %v47_v9  ;;  %v139_v18 = vmul.f32 -1.442695, %v50_v10 }
  0x8f   :  { %v140_v19 = vmul.f32 -1.442695, %v51_v11  ;;  %v44_v20 = vpop.permute.xlu0 %43 }
  0x90   :  { %149 = vpow2.f32 %v135_v16  ;;  %v48_v21 = vmul.f32 %v44_v20, %v28_v12  ;;  %v49_v22 = vmul.f32 %v44_v20, %v29_v13  ;;  %v52_v23 = vmul.f32 %v44_v20, %v32_v14 }
  0x91   :  { %151 = vpow2.f32 %v136_v17  ;;  %v53_v24 = vmul.f32 %v44_v20, %v33_v15 }
  0x92   :  { %153 = vpow2.f32 %v139_v18  ;;  %v137_v25 = vmul.f32 -1.442695, %v48_v21  ;;  %v138_v26 = vmul.f32 -1.442695, %v49_v22  ;;  %v141_v27 = vmul.f32 -1.442695, %v52_v23 }
  0x93   :  { %155 = vpow2.f32 %v140_v19  ;;  %v142_v28 = vmul.f32 -1.442695, %v53_v24 }
  0x94   :  { %157 = vpow2.f32 %v137_v25 }
  0x95   :  { %159 = vpow2.f32 %v138_v26 }
  0x96   :  { %161 = vpow2.f32 %v141_v27 }
  0x97   :  { %163 = vpow2.f32 %v142_v28 }
  0x9d   :  { %v150_v29 = vpop.eup %149 }
  0x9e   :  { %v152_v30 = vpop.eup %151  ;;  %v78_v31 = vadd.f32 1.0, %v150_v29 }
  0x9f   :  { %v154_v32 = vpop.eup %153  ;;  %v79_v33 = vadd.f32 1.0, %v152_v30 }
  0xa0   :  { %v156_v34 = vpop.eup %155  ;;  %v82_v35 = vadd.f32 1.0, %v154_v32  ;;  %165 = vrcp.f32 %v78_v31 }
  0xa1   :  { %v158_v36 = vpop.eup %157  ;;  %v83_v37 = vadd.f32 1.0, %v156_v34  ;;  %167 = vrcp.f32 %v79_v33 }
  0xa2   :  { %v160_v38 = vpop.eup %159  ;;  %169 = vrcp.f32 %v82_v35  ;;  %v80_v39 = vadd.f32 1.0, %v158_v36 }
  0xa3   :  { %v162_v40 = vpop.eup %161  ;;  %171 = vrcp.f32 %v83_v37  ;;  %v81_v41 = vadd.f32 1.0, %v160_v38 }
  0xa4   :  { %v164_v42 = vpop.eup %163  ;;  %v84_v43 = vadd.f32 1.0, %v162_v40  ;;  %173 = vrcp.f32 %v80_v39 }
  0xa5   :  { %v85_v44 = vadd.f32 1.0, %v164_v42  ;;  %175 = vrcp.f32 %v81_v41 }
  0xa6   :  { %177 = vrcp.f32 %v84_v43 }
  0xa7   :  { %179 = vrcp.f32 %v85_v44 }
  0xad   :  { %v166_v45 = vpop.eup %165 }
  0xae   :  { %v168_v46 = vpop.eup %167  ;;  %v102_v47 = vmul.f32 2.0, %v166_v45 }
  0xaf   :  { %v170_v48 = vpop.eup %169  ;;  %v103_v49 = vmul.f32 2.0, %v168_v46 }
  0xb0   :  { %v172_v50 = vpop.eup %171  ;;  %v106_v51 = vmul.f32 2.0, %v170_v48  ;;  %110 = vst [vmem:[#allocation5] sm:$0xff] %v102_v47 }
  0xb1   :  { %v174_v52 = vpop.eup %173  ;;  %v107_v53 = vmul.f32 2.0, %v172_v50  ;;  %111 = vst [vmem:[#allocation5 + $0x8] sm:$0xff] %v103_v49 }
  0xb2   :  { %v176_v54 = vpop.eup %175  ;;  %114 = vst [vmem:[#allocation5 + $0x20] sm:$0xff] %v106_v51  ;;  %v104_v55 = vmul.f32 2.0, %v174_v52 }
  0xb3   :  { %v178_v56 = vpop.eup %177  ;;  %115 = vst [vmem:[#allocation5 + $0x28] sm:$0xff] %v107_v53  ;;  %v105_v57 = vmul.f32 2.0, %v176_v54 }
  0xb4   :  { %v180_v58 = vpop.eup %179  ;;  %v108_v59 = vmul.f32 2.0, %v178_v56  ;;  %112 = vst [vmem:[#allocation5 + $0x10] sm:$0xff] %v104_v55 }
  0xb5   :  { %v109_v60 = vmul.f32 2.0, %v180_v58  ;;  %113 = vst [vmem:[#allocation5 + $0x18] sm:$0xff] %v105_v57 }
  0xb6   :  { %116 = vst [vmem:[#allocation5 + $0x30] sm:$0xff] %v108_v59 }
  0xb7   :  { %117 = vst [vmem:[#allocation5 + $0x38] sm:$0xff] %v109_v60 }
  0xb8   :  { %212 = shalt.err (!%p209_p9)
}
  0xb9   :  { %129 = dma.vmem_to_hbm [thread:$0]  %s124_s1, 1024, %s265_s2, [#allocation4], %s226_s12, %s226_s12, %s227_s13  }
  0xba   :  { %223 = dma.done.wait [#allocation4], 1024  }
  0xbb   :  { %224 = vsyncadd [#allocation4], 4294966272 }
  0xbc   :  { %133 = vsyncpa [#allocation3], 1 }
  0xbd   :  { %134 = vsyncpa [#allocation4], 1 }

</bundles_post_ra>
